<compile_context>
chip_gen: v7x
topology: tpu7x:2x2x1
jax: 0.10.0
libtpu: 0.0.40
codegen_flags: <defaults>
</compile_context>

<pallas_src>
import math

import jax
import jax.numpy as jnp
from jax import lax
from jax.experimental import pallas as pl
from jax.experimental.pallas import tpu as pltpu


# ---------------------------------------------------------------------------
# Kernel 1: fused input projections over a flattened (B*S) row axis.
#   x (tile_r, D) -> Q1, Q2, K1, K2 (tile_r, c) and V' (tile_r, D)
# ---------------------------------------------------------------------------
def _proj_kernel(x_ref, wq1_ref, wq2_ref, wk1_ref, wk2_ref, wv_ref,
                 bq1_ref, bq2_ref, bk1_ref, bk2_ref, bv_ref,
                 q1_ref, q2_ref, k1_ref, k2_ref, v_ref):
    x = x_ref[...]                                      # (tile_r, D) bf16

    def proj(w_ref, b_ref, o_ref):
        y = jnp.dot(x, w_ref[...], preferred_element_type=jnp.float32) + b_ref[...]
        o_ref[...] = y.astype(o_ref.dtype)

    proj(wq1_ref, bq1_ref, q1_ref)   # 1/sqrt(head_dim) pre-folded into wq1/bq1
    proj(wq2_ref, bq2_ref, q2_ref)
    proj(wk1_ref, bk1_ref, k1_ref)
    proj(wk2_ref, bk2_ref, k2_ref)
    proj(wv_ref, bv_ref, v_ref)      # V' = x @ (wv @ wout) + bv @ wout


# ---------------------------------------------------------------------------
# Kernel 2: flash-style differential attention (out_proj already folded into V').
#   grid = (B, num_q_tiles, num_kv_tiles); kv axis is the innermost reduction.
# ---------------------------------------------------------------------------
def _flash_diff_attn_kernel(lam_ref, q1_ref, q2_ref, k1_ref, k2_ref, v_ref, bout_ref,
                            o_ref,
                            m1_ref, l1_ref, acc1_ref,
                            m2_ref, l2_ref, acc2_ref):
    ki = pl.program_id(2)

    @pl.when(ki == 0)
    def _init():
        m1_ref[...] = jnp.full(m1_ref.shape, -jnp.inf, jnp.float32)
        m2_ref[...] = jnp.full(m2_ref.shape, -jnp.inf, jnp.float32)
        l1_ref[...] = jnp.zeros(l1_ref.shape, jnp.float32)
        l2_ref[...] = jnp.zeros(l2_ref.shape, jnp.float32)
        acc1_ref[...] = jnp.zeros(acc1_ref.shape, jnp.float32)
        acc2_ref[...] = jnp.zeros(acc2_ref.shape, jnp.float32)

    q1 = q1_ref[0]        # (tq, c) bf16, softmax scale pre-folded
    q2 = q2_ref[0]
    k1 = k1_ref[0]        # (tk, c) bf16
    k2 = k2_ref[0]
    v = v_ref[0]          # (tk, D) bf16 (out_proj folded in)

    # Contract the last dims directly -> no explicit K transpose (no XLU copy).
    qk_dims = (((1,), (1,)), ((), ()))
    s1 = lax.dot_general(q1, k1, qk_dims, preferred_element_type=jnp.float32)  # (tq, tk) f32
    s2 = lax.dot_general(q2, k2, qk_dims, preferred_element_type=jnp.float32)

    def online_update(s, m_ref, l_ref, acc_ref):
        m_prev = m_ref[...]
        m_new = jnp.maximum(m_prev, jnp.max(s, axis=-1, keepdims=True))
        alpha = jnp.exp(m_prev - m_new)
        p = jnp.exp(s - m_new)
        l_ref[...] = alpha * l_ref[...] + jnp.sum(p, axis=-1, keepdims=True)
        acc_ref[...] = alpha * acc_ref[...] + jnp.dot(
            p.astype(v.dtype), v, preferred_element_type=jnp.float32)
        m_ref[...] = m_new

    online_update(s1, m1_ref, l1_ref, acc1_ref)
    online_update(s2, m2_ref, l2_ref, acc2_ref)

    @pl.when(ki == pl.num_programs(2) - 1)
    def _finalize():
        lam = lam_ref[0, 0]
        # Finalize runs once per (b, q-tile): exact reciprocal is essentially free here.
        r1 = 1.0 / l1_ref[...]
        r2 = 1.0 / l2_ref[...]
        # differential softmax: lambda folded into the second normalization; bias-only epilogue.
        out = acc1_ref[...] * r1 - acc2_ref[...] * (lam * r2) + bout_ref[...]
        o_ref[0] = out.astype(o_ref.dtype)


def _pick_tile(n, cap):
    """Largest tile <= cap that evenly divides n."""
    for t in (512, 256, 128, 64, 32, 16, 8):
        if t <= cap and t <= n and n % t == 0:
            return t
    return n


def _tpu_vmem_budget():
    """Return (vmem_limit_bytes, physical_capacity). Fallback assumes v7x (64 MiB / TC)."""
    try:
        cap = int(pltpu.get_tpu_info().vmem_capacity_bytes)
    except Exception:
        cap = 64 * 1024 * 1024
    return int(min(0.75 * cap, 100 * 1024 * 1024)), cap


def differential_attention(x, params, *, n_heads, lambda_init=0.8, layer_index=0,
                           tile_q=None, tile_kv=None, tile_r=None,
                           out_dtype=None, single_buffer_weights=True):
    B, S, D = x.shape
    assert D % n_heads == 0 and D % 2 == 0
    head_dim = D // n_heads
    c = D // 2
    rows = B * S
    out_dtype = out_dtype or x.dtype

    f32 = jnp.float32
    bf16 = jnp.bfloat16
    scale = 1.0 / math.sqrt(head_dim)

    vmem_limit, vmem_cap = _tpu_vmem_budget()
    m_cap = 512 if vmem_cap >= 96 * 1024 * 1024 else 256    # v5e/v6e vs v7x

    tile_r = tile_r or _pick_tile(rows, m_cap)
    tile_q = tile_q or _pick_tile(S, m_cap)
    # Bound score-tile vreg pressure: s1/s2/p1/p2 are (tile_q, tile_kv) f32 each.
    tile_kv = tile_kv or _pick_tile(S, min(256, max(8, 32768 // tile_q)))
    assert rows % tile_r == 0 and S % tile_q == 0 and S % tile_kv == 0

    # ---- parameter glue (plain JAX, runs once): split qkv, fold scale, fold out_proj ----
    wqkv = params["wqkv"].astype(f32)
    bqkv = params["bqkv"].astype(f32)
    wq1 = (wqkv[:, 0 * c:1 * c] * scale).astype(bf16)
    wq2 = (wqkv[:, 1 * c:2 * c] * scale).astype(bf16)
    wk1 = wqkv[:, 2 * c:3 * c].astype(bf16)
    wk2 = wqkv[:, 3 * c:4 * c].astype(bf16)
    bq1 = (bqkv[0 * c:1 * c] * scale).reshape(1, c)
    bq2 = (bqkv[1 * c:2 * c] * scale).reshape(1, c)
    bk1 = bqkv[2 * c:3 * c].reshape(1, c)
    bk2 = bqkv[3 * c:4 * c].reshape(1, c)

    # Fold out_proj into the value projection (exact in eval mode; dropout == identity):
    #   (P @ (x @ wv + bv)) @ wout + bout == P @ (x @ (wv @ wout) + bv @ wout) + bout
    wv_f32 = params["wv"].astype(f32)
    bv_f32 = params["bv"].astype(f32)
    wout_f32 = params["wout"].astype(f32)
    wv_fold = (wv_f32 @ wout_f32).astype(bf16)               # (D, D)
    bv_fold = (bv_f32 @ wout_f32).reshape(1, D)              # (1, D) f32
    bout = params["bout"].astype(f32).reshape(1, D)

    lam_q1k1 = jnp.sum(params["lambda_q1"].astype(f32) * params["lambda_k1"].astype(f32))
    lam_q2k2 = jnp.sum(params["lambda_q2"].astype(f32) * params["lambda_k2"].astype(f32))
    lambda_decay = lambda_init - 0.6 * jnp.exp(f32(-0.3 * layer_index))
    lam = (jnp.exp(lam_q1k1) - jnp.exp(lam_q2k2) + lambda_decay).reshape(1, 1).astype(f32)

    x_rows = x.reshape(rows, D).astype(bf16)   # flatten (B, S); bf16 halves the x DMA bytes

    nr = rows // tile_r
    nq = S // tile_q
    nk = S // tile_kv

    proj_cost = pl.CostEstimate(
        flops=int(2 * rows * D * (2 * D + D)),
        transcendentals=0,
        bytes_accessed=int(2 * (rows * D + D * (2 * D + D) + rows * (2 * D + D))),
    )
    attn_cost = pl.CostEstimate(
        flops=int(6 * B * S * S * D),
        transcendentals=int(2 * B * S * S),
        bytes_accessed=int(2 * B * S * (4 * c + D)
                           + max(nq - 1, 0) * 2 * B * S * (2 * c + D)
                           + 4 * B * S * D),
    )

    def const_spec(block_shape, index_map, single_buffer):
        """Constant-index_map operand; single-buffered when supported (pl.Buffered(1))."""
        if single_buffer and hasattr(pl, "Buffered"):
            try:
                return pl.BlockSpec(block_shape, index_map, pipeline_mode=pl.Buffered(1))
            except TypeError:
                pass
        return pl.BlockSpec(block_shape, index_map)

    def _run(single_buffer):
        # ---------------------------- kernel 1: projections ----------------------------
        cmap1 = lambda r: (0, 0)
        w_spec_c = const_spec((D, c), cmap1, single_buffer)
        b_spec_c = const_spec((1, c), cmap1, single_buffer)
        w_spec_d = const_spec((D, D), cmap1, single_buffer)
        b_spec_d = const_spec((1, D), cmap1, single_buffer)

        q1, q2, k1, k2, v = pl.pallas_call(
            _proj_kernel,
            out_shape=(
                jax.ShapeDtypeStruct((rows, c), bf16),
                jax.ShapeDtypeStruct((rows, c), bf16),
                jax.ShapeDtypeStruct((rows, c), bf16),
                jax.ShapeDtypeStruct((rows, c), bf16),
                jax.ShapeDtypeStruct((rows, D), bf16),
            ),
            grid_spec=pltpu.PrefetchScalarGridSpec(
                num_scalar_prefetch=0,
                grid=(nr,),
                in_specs=[
                    pl.BlockSpec((tile_r, D), lambda r: (r, 0)),   # x
                    w_spec_c, w_spec_c, w_spec_c, w_spec_c,        # wq1 wq2 wk1 wk2
                    w_spec_d,                                      # wv' (D, D)
                    b_spec_c, b_spec_c, b_spec_c, b_spec_c,        # bq1 bq2 bk1 bk2
                    b_spec_d,                                      # bv' (1, D)
                ],
                out_specs=[
                    pl.BlockSpec((tile_r, c), lambda r: (r, 0)),
                    pl.BlockSpec((tile_r, c), lambda r: (r, 0)),
                    pl.BlockSpec((tile_r, c), lambda r: (r, 0)),
                    pl.BlockSpec((tile_r, c), lambda r: (r, 0)),
                    pl.BlockSpec((tile_r, D), lambda r: (r, 0)),
                ],
            ),
            compiler_params=pltpu.CompilerParams(
                dimension_semantics=("parallel",),
                vmem_limit_bytes=vmem_limit),
            cost_estimate=proj_cost,
        )(x_rows, wq1, wq2, wk1, wk2, wv_fold, bq1, bq2, bk1, bk2, bv_fold)

        q1 = q1.reshape(B, S, c)
        q2 = q2.reshape(B, S, c)
        k1 = k1.reshape(B, S, c)
        k2 = k2.reshape(B, S, c)
        v = v.reshape(B, S, D)

        # --------------------- kernel 2: flash differential attention ------------------
        cmap3 = lambda b, qi, ki: (0, 0)
        bout_spec = const_spec((1, D), cmap3, single_buffer)

        out = pl.pallas_call(
            _flash_diff_attn_kernel,
            out_shape=jax.ShapeDtypeStruct((B, S, D), out_dtype),
            grid_spec=pltpu.PrefetchScalarGridSpec(
                num_scalar_prefetch=0,
                grid=(B, nq, nk),
                in_specs=[
                    pl.BlockSpec(memory_space=pltpu.MemorySpace.SMEM),            # lam (1,1)
                    pl.BlockSpec((1, tile_q, c), lambda b, qi, ki: (b, qi, 0)),   # q1
                    pl.BlockSpec((1, tile_q, c), lambda b, qi, ki: (b, qi, 0)),   # q2
                    pl.BlockSpec((1, tile_kv, c), lambda b, qi, ki: (b, ki, 0)),  # k1
                    pl.BlockSpec((1, tile_kv, c), lambda b, qi, ki: (b, ki, 0)),  # k2
                    pl.BlockSpec((1, tile_kv, D), lambda b, qi, ki: (b, ki, 0)),  # v'
                    bout_spec,                                                    # bout
                ],
                out_specs=pl.BlockSpec((1, tile_q, D), lambda b, qi, ki: (b, qi, 0)),
                scratch_shapes=[
                    pltpu.VMEM((tile_q, 1), jnp.float32),    # m1
                    pltpu.VMEM((tile_q, 1), jnp.float32),    # l1
                    pltpu.VMEM((tile_q, D), jnp.float32),    # acc1
                    pltpu.VMEM((tile_q, 1), jnp.float32),    # m2
                    pltpu.VMEM((tile_q, 1), jnp.float32),    # l2
                    pltpu.VMEM((tile_q, D), jnp.float32),    # acc2
                ],
            ),
            compiler_params=pltpu.CompilerParams(
                dimension_semantics=("parallel", "parallel", "arbitrary"),
                vmem_limit_bytes=vmem_limit),
            cost_estimate=attn_cost,
        )(lam, q1, q2, k1, k2, v, bout)
        return out

    if single_buffer_weights:
        try:
            return _run(True)
        except Exception:
            # Fallback: this JAX version rejects pipeline_mode=pl.Buffered(1); rerun with
            # default double-buffered constant operands (semantics identical).
            pass
    return _run(False)


def _reference(x, params, *, n_heads, lambda_init=0.8, layer_index=0):
    """Pure-JAX f32 reference mirroring the PyTorch forward (eval mode)."""
    B, S, D = x.shape
    head_dim = D // n_heads
    qkv = x @ params["wqkv"] + params["bqkv"]
    c = D // 2
    q1, q2, k1, k2 = (qkv[..., i * c:(i + 1) * c] for i in range(4))
    v = x @ params["wv"] + params["bv"]
    scale = 1.0 / math.sqrt(head_dim)
    a1 = jnp.einsum("bsc,btc->bst", q1, k1) * scale
    a2 = jnp.einsum("bsc,btc->bst", q2, k2) * scale
    a1 = jax.nn.softmax(a1, axis=-1)
    a2 = jax.nn.softmax(a2, axis=-1)
    lam = (jnp.exp(jnp.sum(params["lambda_q1"] * params["lambda_k1"]))
           - jnp.exp(jnp.sum(params["lambda_q2"] * params["lambda_k2"]))
           + (lambda_init - 0.6 * jnp.exp(jnp.float32(-0.3 * layer_index))))
    diff = a1 - lam * a2
    out = jnp.einsum("bst,btd->bsd", diff, v)
    return out @ params["wout"] + params["bout"]


if __name__ == "__main__":
    B, S, D, H = 2, 32, 32, 4
    head_dim = D // H
    dv = 2 * D * H

    key = jax.random.PRNGKey(0)
    keys = jax.random.split(key, 11)
    w_scale = 0.05
    params = {
        "wqkv": w_scale * jax.random.normal(keys[0], (D, 2 * D), jnp.float32),
        "bqkv": w_scale * jax.random.normal(keys[1], (2 * D,), jnp.float32),
        "wv": w_scale * jax.random.normal(keys[2], (D, dv), jnp.float32),
        "bv": w_scale * jax.random.normal(keys[3], (dv,), jnp.float32),
        "wout": w_scale * jax.random.normal(keys[4], (dv, D), jnp.float32),
        "bout": w_scale * jax.random.normal(keys[5], (D,), jnp.float32),
        # modest lambda params keep lambda_final O(0.2) so bf16-vs-f32 comparison is meaningful
        "lambda_q1": 0.1 * jax.random.normal(keys[6], (head_dim,), jnp.float32),
        "lambda_k1": 0.1 * jax.random.normal(keys[7], (head_dim,), jnp.float32),
        "lambda_q2": 0.1 * jax.random.normal(keys[8], (head_dim,), jnp.float32),
        "lambda_k2": 0.1 * jax.random.normal(keys[9], (head_dim,), jnp.float32),
    }
    x = jax.random.normal(keys[10], (B, S, D), jnp.float32)

    # tiles of 16 deliberately exercise multiple q-, kv- and row-tiles (online-softmax path)
    out = differential_attention(x, params, n_heads=H, lambda_init=0.8, layer_index=0,
                                 tile_q=16, tile_kv=16, tile_r=16)
    out = jax.block_until_ready(out)

    ref = _reference(x, params, n_heads=H, lambda_init=0.8, layer_index=0)
    assert out.shape == (B, S, D)
    # bf16 MXU operands + folded (wv @ wout) => tolerance looser than a pure-f32 variant.
    rel_err = float(jnp.linalg.norm(out.astype(jnp.float32) - ref) / jnp.linalg.norm(ref))
    assert rel_err < 3e-2, f"relative L2 error too large: {rel_err}"

    print("KERNEL_OK")
</pallas_src>

<mosaic_0001>
module attributes {stable_mosaic.version = 11 : i64} {
  func.func @_proj_kernel(%arg0: i32, %arg1: memref<16x32xbf16, #tpu.memory_space<vmem>>, %arg2: memref<32x16xbf16, #tpu.memory_space<vmem>>, %arg3: memref<32x16xbf16, #tpu.memory_space<vmem>>, %arg4: memref<32x16xbf16, #tpu.memory_space<vmem>>, %arg5: memref<32x16xbf16, #tpu.memory_space<vmem>>, %arg6: memref<32x32xbf16, #tpu.memory_space<vmem>>, %arg7: memref<1x16xf32, #tpu.memory_space<vmem>>, %arg8: memref<1x16xf32, #tpu.memory_space<vmem>>, %arg9: memref<1x16xf32, #tpu.memory_space<vmem>>, %arg10: memref<1x16xf32, #tpu.memory_space<vmem>>, %arg11: memref<1x32xf32, #tpu.memory_space<vmem>>, %arg12: memref<16x16xbf16, #tpu.memory_space<vmem>>, %arg13: memref<16x16xbf16, #tpu.memory_space<vmem>>, %arg14: memref<16x16xbf16, #tpu.memory_space<vmem>>, %arg15: memref<16x16xbf16, #tpu.memory_space<vmem>>, %arg16: memref<16x32xbf16, #tpu.memory_space<vmem>>) attributes {dimension_semantics = [#tpu.dimension_semantics<parallel>], iteration_bounds = array<i64: 4>, scalar_prefetch = 0 : i64, scratch_operands = 0 : i64, tpu.core_type = #tpu.core_type<tc>, window_params = [{transform_indices = @transform_0, window_bounds = array<i64: 16, 32>}, {pipeline_mode = #tpu.pipeline_mode<synchronous>, transform_indices = @transform_1, window_bounds = array<i64: 32, 16>}, {pipeline_mode = #tpu.pipeline_mode<synchronous>, transform_indices = @transform_2, window_bounds = array<i64: 32, 16>}, {pipeline_mode = #tpu.pipeline_mode<synchronous>, transform_indices = @transform_3, window_bounds = array<i64: 32, 16>}, {pipeline_mode = #tpu.pipeline_mode<synchronous>, transform_indices = @transform_4, window_bounds = array<i64: 32, 16>}, {pipeline_mode = #tpu.pipeline_mode<synchronous>, transform_indices = @transform_5, window_bounds = array<i64: 32, 32>}, {pipeline_mode = #tpu.pipeline_mode<synchronous>, transform_indices = @transform_6, window_bounds = array<i64: 1, 16>}, {pipeline_mode = #tpu.pipeline_mode<synchronous>, transform_indices = @transform_7, window_bounds = array<i64: 1, 16>}, {pipeline_mode = #tpu.pipeline_mode<synchronous>, transform_indices = @transform_8, window_bounds = array<i64: 1, 16>}, {pipeline_mode = #tpu.pipeline_mode<synchronous>, transform_indices = @transform_9, window_bounds = array<i64: 1, 16>}, {pipeline_mode = #tpu.pipeline_mode<synchronous>, transform_indices = @transform_10, window_bounds = array<i64: 1, 32>}, {transform_indices = @transform_11, window_bounds = array<i64: 16, 16>}, {transform_indices = @transform_12, window_bounds = array<i64: 16, 16>}, {transform_indices = @transform_13, window_bounds = array<i64: 16, 16>}, {transform_indices = @transform_14, window_bounds = array<i64: 16, 16>}, {transform_indices = @transform_15, window_bounds = array<i64: 16, 32>}]} {
    %c0 = arith.constant 0 : index
    %c0_0 = arith.constant 0 : index
    %0 = vector.load %arg1[%c0, %c0_0] : memref<16x32xbf16, #tpu.memory_space<vmem>>, vector<16x32xbf16>
    %c0_1 = arith.constant 0 : index
    %c0_2 = arith.constant 0 : index
    %1 = vector.load %arg2[%c0_1, %c0_2] : memref<32x16xbf16, #tpu.memory_space<vmem>>, vector<32x16xbf16>
    %cst = arith.constant dense<0.000000e+00> : vector<16x16xf32>
    %2 = tpu.matmul %0, %1, %cst {dimension_numbers = #tpu.dot_dimension_numbers<[1], [0], [0], [1], [0, 0, 1, 1], [], []>} : vector<16x32xbf16>, vector<32x16xbf16>, vector<16x16xf32> -> vector<16x16xf32>
    %c0_3 = arith.constant 0 : index
    %c0_4 = arith.constant 0 : index
    %3 = vector.load %arg7[%c0_3, %c0_4] : memref<1x16xf32, #tpu.memory_space<vmem>>, vector<1x16xf32>
    %4 = vector.broadcast %3 : vector<1x16xf32> to vector<16x16xf32>
    %5 = arith.addf %2, %4 : vector<16x16xf32>
    %6 = arith.truncf %5 : vector<16x16xf32> to vector<16x16xbf16>
    %c0_5 = arith.constant 0 : index
    %c0_6 = arith.constant 0 : index
    %7 = vector.load %arg12[%c0_5, %c0_6] : memref<16x16xbf16, #tpu.memory_space<vmem>>, vector<16x16xbf16>
    tpu.vector_store %arg12[%c0_5, %c0_6], %6 {strides = array<i32>} : memref<16x16xbf16, #tpu.memory_space<vmem>>, vector<16x16xbf16>,
    %c0_7 = arith.constant 0 : index
    %c0_8 = arith.constant 0 : index
    %8 = vector.load %arg3[%c0_7, %c0_8] : memref<32x16xbf16, #tpu.memory_space<vmem>>, vector<32x16xbf16>
    %cst_9 = arith.constant dense<0.000000e+00> : vector<16x16xf32>
    %9 = tpu.matmul %0, %8, %cst_9 {dimension_numbers = #tpu.dot_dimension_numbers<[1], [0], [0], [1], [0, 0, 1, 1], [], []>} : vector<16x32xbf16>, vector<32x16xbf16>, vector<16x16xf32> -> vector<16x16xf32>
    %c0_10 = arith.constant 0 : index
    %c0_11 = arith.constant 0 : index
    %10 = vector.load %arg8[%c0_10, %c0_11] : memref<1x16xf32, #tpu.memory_space<vmem>>, vector<1x16xf32>
    %11 = vector.broadcast %10 : vector<1x16xf32> to vector<16x16xf32>
    %12 = arith.addf %9, %11 : vector<16x16xf32>
    %13 = arith.truncf %12 : vector<16x16xf32> to vector<16x16xbf16>
    %c0_12 = arith.constant 0 : index
    %c0_13 = arith.constant 0 : index
    %14 = vector.load %arg13[%c0_12, %c0_13] : memref<16x16xbf16, #tpu.memory_space<vmem>>, vector<16x16xbf16>
    tpu.vector_store %arg13[%c0_12, %c0_13], %13 {strides = array<i32>} : memref<16x16xbf16, #tpu.memory_space<vmem>>, vector<16x16xbf16>,
    %c0_14 = arith.constant 0 : index
    %c0_15 = arith.constant 0 : index
    %15 = vector.load %arg4[%c0_14, %c0_15] : memref<32x16xbf16, #tpu.memory_space<vmem>>, vector<32x16xbf16>
    %cst_16 = arith.constant dense<0.000000e+00> : vector<16x16xf32>
    %16 = tpu.matmul %0, %15, %cst_16 {dimension_numbers = #tpu.dot_dimension_numbers<[1], [0], [0], [1], [0, 0, 1, 1], [], []>} : vector<16x32xbf16>, vector<32x16xbf16>, vector<16x16xf32> -> vector<16x16xf32>
    %c0_17 = arith.constant 0 : index
    %c0_18 = arith.constant 0 : index
    %17 = vector.load %arg9[%c0_17, %c0_18] : memref<1x16xf32, #tpu.memory_space<vmem>>, vector<1x16xf32>
    %18 = vector.broadcast %17 : vector<1x16xf32> to vector<16x16xf32>
    %19 = arith.addf %16, %18 : vector<16x16xf32>
    %20 = arith.truncf %19 : vector<16x16xf32> to vector<16x16xbf16>
    %c0_19 = arith.constant 0 : index
    %c0_20 = arith.constant 0 : index
    %21 = vector.load %arg14[%c0_19, %c0_20] : memref<16x16xbf16, #tpu.memory_space<vmem>>, vector<16x16xbf16>
    tpu.vector_store %arg14[%c0_19, %c0_20], %20 {strides = array<i32>} : memref<16x16xbf16, #tpu.memory_space<vmem>>, vector<16x16xbf16>,
    %c0_21 = arith.constant 0 : index
    %c0_22 = arith.constant 0 : index
    %22 = vector.load %arg5[%c0_21, %c0_22] : memref<32x16xbf16, #tpu.memory_space<vmem>>, vector<32x16xbf16>
    %cst_23 = arith.constant dense<0.000000e+00> : vector<16x16xf32>
    %23 = tpu.matmul %0, %22, %cst_23 {dimension_numbers = #tpu.dot_dimension_numbers<[1], [0], [0], [1], [0, 0, 1, 1], [], []>} : vector<16x32xbf16>, vector<32x16xbf16>, vector<16x16xf32> -> vector<16x16xf32>
    %c0_24 = arith.constant 0 : index
    %c0_25 = arith.constant 0 : index
    %24 = vector.load %arg10[%c0_24, %c0_25] : memref<1x16xf32, #tpu.memory_space<vmem>>, vector<1x16xf32>
    %25 = vector.broadcast %24 : vector<1x16xf32> to vector<16x16xf32>
    %26 = arith.addf %23, %25 : vector<16x16xf32>
    %27 = arith.truncf %26 : vector<16x16xf32> to vector<16x16xbf16>
    %c0_26 = arith.constant 0 : index
    %c0_27 = arith.constant 0 : index
    %28 = vector.load %arg15[%c0_26, %c0_27] : memref<16x16xbf16, #tpu.memory_space<vmem>>, vector<16x16xbf16>
    tpu.vector_store %arg15[%c0_26, %c0_27], %27 {strides = array<i32>} : memref<16x16xbf16, #tpu.memory_space<vmem>>, vector<16x16xbf16>,
    %c0_28 = arith.constant 0 : index
    %c0_29 = arith.constant 0 : index
    %29 = vector.load %arg6[%c0_28, %c0_29] : memref<32x32xbf16, #tpu.memory_space<vmem>>, vector<32x32xbf16>
    %cst_30 = arith.constant dense<0.000000e+00> : vector<16x32xf32>
    %30 = tpu.matmul %0, %29, %cst_30 {dimension_numbers = #tpu.dot_dimension_numbers<[1], [0], [0], [1], [0, 0, 1, 1], [], []>} : vector<16x32xbf16>, vector<32x32xbf16>, vector<16x32xf32> -> vector<16x32xf32>
    %c0_31 = arith.constant 0 : index
    %c0_32 = arith.constant 0 : index
    %31 = vector.load %arg11[%c0_31, %c0_32] : memref<1x32xf32, #tpu.memory_space<vmem>>, vector<1x32xf32>
    %32 = vector.broadcast %31 : vector<1x32xf32> to vector<16x32xf32>
    %33 = arith.addf %30, %32 : vector<16x32xf32>
    %34 = arith.truncf %33 : vector<16x32xf32> to vector<16x32xbf16>
    %c0_33 = arith.constant 0 : index
    %c0_34 = arith.constant 0 : index
    %35 = vector.load %arg16[%c0_33, %c0_34] : memref<16x32xbf16, #tpu.memory_space<vmem>>, vector<16x32xbf16>
    tpu.vector_store %arg16[%c0_33, %c0_34], %34 {strides = array<i32>} : memref<16x32xbf16, #tpu.memory_space<vmem>>, vector<16x32xbf16>,
    return
  }
  func.func @transform_0(%arg0: i32) -> (i32, i32) {
    %c0_i32 = arith.constant 0 : i32
    %c0_i32_0 = arith.constant 0 : i32
    return %arg0, %c0_i32 : i32, i32
  }
  func.func @transform_1(%arg0: i32) -> (i32, i32) {
    %c0_i32 = arith.constant 0 : i32
    %c0_i32_0 = arith.constant 0 : i32
    %c0_i32_1 = arith.constant 0 : i32
    return %c0_i32, %c0_i32_0 : i32, i32
  }
  func.func @transform_2(%arg0: i32) -> (i32, i32) {
    %c0_i32 = arith.constant 0 : i32
    %c0_i32_0 = arith.constant 0 : i32
    %c0_i32_1 = arith.constant 0 : i32
    return %c0_i32, %c0_i32_0 : i32, i32
  }
  func.func @transform_3(%arg0: i32) -> (i32, i32) {
    %c0_i32 = arith.constant 0 : i32
    %c0_i32_0 = arith.constant 0 : i32
    %c0_i32_1 = arith.constant 0 : i32
    return %c0_i32, %c0_i32_0 : i32, i32
  }
  func.func @transform_4(%arg0: i32) -> (i32, i32) {
    %c0_i32 = arith.constant 0 : i32
    %c0_i32_0 = arith.constant 0 : i32
    %c0_i32_1 = arith.constant 0 : i32
    return %c0_i32, %c0_i32_0 : i32, i32
  }
  func.func @transform_5(%arg0: i32) -> (i32, i32) {
    %c0_i32 = arith.constant 0 : i32
    %c0_i32_0 = arith.constant 0 : i32
    %c0_i32_1 = arith.constant 0 : i32
    return %c0_i32, %c0_i32_0 : i32, i32
  }
  func.func @transform_6(%arg0: i32) -> (i32, i32) {
    %c0_i32 = arith.constant 0 : i32
    %c0_i32_0 = arith.constant 0 : i32
    %c0_i32_1 = arith.constant 0 : i32
    return %c0_i32, %c0_i32_0 : i32, i32
  }
  func.func @transform_7(%arg0: i32) -> (i32, i32) {
    %c0_i32 = arith.constant 0 : i32
    %c0_i32_0 = arith.constant 0 : i32
    %c0_i32_1 = arith.constant 0 : i32
    return %c0_i32, %c0_i32_0 : i32, i32
  }
  func.func @transform_8(%arg0: i32) -> (i32, i32) {
    %c0_i32 = arith.constant 0 : i32
    %c0_i32_0 = arith.constant 0 : i32
    %c0_i32_1 = arith.constant 0 : i32
    return %c0_i32, %c0_i32_0 : i32, i32
  }
  func.func @transform_9(%arg0: i32) -> (i32, i32) {
    %c0_i32 = arith.constant 0 : i32
    %c0_i32_0 = arith.constant 0 : i32
    %c0_i32_1 = arith.constant 0 : i32
    return %c0_i32, %c0_i32_0 : i32, i32
  }
  func.func @transform_10(%arg0: i32) -> (i32, i32) {
    %c0_i32 = arith.constant 0 : i32
    %c0_i32_0 = arith.constant 0 : i32
    %c0_i32_1 = arith.constant 0 : i32
    return %c0_i32, %c0_i32_0 : i32, i32
  }
  func.func @transform_11(%arg0: i32) -> (i32, i32) {
    %c0_i32 = arith.constant 0 : i32
    %c0_i32_0 = arith.constant 0 : i32
    return %arg0, %c0_i32 : i32, i32
  }
  func.func @transform_12(%arg0: i32) -> (i32, i32) {
    %c0_i32 = arith.constant 0 : i32
    %c0_i32_0 = arith.constant 0 : i32
    return %arg0, %c0_i32 : i32, i32
  }
  func.func @transform_13(%arg0: i32) -> (i32, i32) {
    %c0_i32 = arith.constant 0 : i32
    %c0_i32_0 = arith.constant 0 : i32
    return %arg0, %c0_i32 : i32, i32
  }
  func.func @transform_14(%arg0: i32) -> (i32, i32) {
    %c0_i32 = arith.constant 0 : i32
    %c0_i32_0 = arith.constant 0 : i32
    return %arg0, %c0_i32 : i32, i32
  }
  func.func @transform_15(%arg0: i32) -> (i32, i32) {
    %c0_i32 = arith.constant 0 : i32
    %c0_i32_0 = arith.constant 0 : i32
    return %arg0, %c0_i32 : i32, i32
  }
}

module attributes {stable_mosaic.version = 11 : i64} {
  func.func @_proj_kernel(%arg0: i32, %arg1: memref<16x32xbf16, #tpu.memory_space<vmem>>, %arg2: memref<32x16xbf16, #tpu.memory_space<vmem>>, %arg3: memref<32x16xbf16, #tpu.memory_space<vmem>>, %arg4: memref<32x16xbf16, #tpu.memory_space<vmem>>, %arg5: memref<32x16xbf16, #tpu.memory_space<vmem>>, %arg6: memref<32x32xbf16, #tpu.memory_space<vmem>>, %arg7: memref<1x16xf32, #tpu.memory_space<vmem>>, %arg8: memref<1x16xf32, #tpu.memory_space<vmem>>, %arg9: memref<1x16xf32, #tpu.memory_space<vmem>>, %arg10: memref<1x16xf32, #tpu.memory_space<vmem>>, %arg11: memref<1x32xf32, #tpu.memory_space<vmem>>, %arg12: memref<16x16xbf16, #tpu.memory_space<vmem>>, %arg13: memref<16x16xbf16, #tpu.memory_space<vmem>>, %arg14: memref<16x16xbf16, #tpu.memory_space<vmem>>, %arg15: memref<16x16xbf16, #tpu.memory_space<vmem>>, %arg16: memref<16x32xbf16, #tpu.memory_space<vmem>>) attributes {dimension_semantics = [#tpu.dimension_semantics<parallel>], iteration_bounds = array<i64: 4>, scalar_prefetch = 0 : i64, scratch_operands = 0 : i64, tpu.core_type = #tpu.core_type<tc>, window_params = [{transform_indices = @transform_0, window_bounds = array<i64: 16, 32>}, {pipeline_mode = #tpu.pipeline_mode<synchronous>, transform_indices = @transform_1, window_bounds = array<i64: 32, 16>}, {pipeline_mode = #tpu.pipeline_mode<synchronous>, transform_indices = @transform_2, window_bounds = array<i64: 32, 16>}, {pipeline_mode = #tpu.pipeline_mode<synchronous>, transform_indices = @transform_3, window_bounds = array<i64: 32, 16>}, {pipeline_mode = #tpu.pipeline_mode<synchronous>, transform_indices = @transform_4, window_bounds = array<i64: 32, 16>}, {pipeline_mode = #tpu.pipeline_mode<synchronous>, transform_indices = @transform_5, window_bounds = array<i64: 32, 32>}, {pipeline_mode = #tpu.pipeline_mode<synchronous>, transform_indices = @transform_6, window_bounds = array<i64: 1, 16>}, {pipeline_mode = #tpu.pipeline_mode<synchronous>, transform_indices = @transform_7, window_bounds = array<i64: 1, 16>}, {pipeline_mode = #tpu.pipeline_mode<synchronous>, transform_indices = @transform_8, window_bounds = array<i64: 1, 16>}, {pipeline_mode = #tpu.pipeline_mode<synchronous>, transform_indices = @transform_9, window_bounds = array<i64: 1, 16>}, {pipeline_mode = #tpu.pipeline_mode<synchronous>, transform_indices = @transform_10, window_bounds = array<i64: 1, 32>}, {transform_indices = @transform_11, window_bounds = array<i64: 16, 16>}, {transform_indices = @transform_12, window_bounds = array<i64: 16, 16>}, {transform_indices = @transform_13, window_bounds = array<i64: 16, 16>}, {transform_indices = @transform_14, window_bounds = array<i64: 16, 16>}, {transform_indices = @transform_15, window_bounds = array<i64: 16, 32>}]} {
    %c0 = arith.constant 0 : index
    %c0_0 = arith.constant 0 : index
    %0 = vector.load %arg1[%c0, %c0_0] : memref<16x32xbf16, #tpu.memory_space<vmem>>, vector<16x32xbf16>
    %c0_1 = arith.constant 0 : index
    %c0_2 = arith.constant 0 : index
    %1 = vector.load %arg2[%c0_1, %c0_2] : memref<32x16xbf16, #tpu.memory_space<vmem>>, vector<32x16xbf16>
    %cst = arith.constant dense<0.000000e+00> : vector<16x16xf32>
    %2 = tpu.matmul %0, %1, %cst {dimension_numbers = #tpu.dot_dimension_numbers<[1], [0], [0], [1], [0, 0, 1, 1], [], []>} : vector<16x32xbf16>, vector<32x16xbf16>, vector<16x16xf32> -> vector<16x16xf32>
    %c0_3 = arith.constant 0 : index
    %c0_4 = arith.constant 0 : index
    %3 = vector.load %arg7[%c0_3, %c0_4] : memref<1x16xf32, #tpu.memory_space<vmem>>, vector<1x16xf32>
    %4 = vector.broadcast %3 : vector<1x16xf32> to vector<16x16xf32>
    %5 = arith.addf %2, %4 : vector<16x16xf32>
    %6 = arith.truncf %5 : vector<16x16xf32> to vector<16x16xbf16>
    %c0_5 = arith.constant 0 : index
    %c0_6 = arith.constant 0 : index
    %7 = vector.load %arg12[%c0_5, %c0_6] : memref<16x16xbf16, #tpu.memory_space<vmem>>, vector<16x16xbf16>
    tpu.vector_store %arg12[%c0_5, %c0_6], %6 {strides = array<i32>} : memref<16x16xbf16, #tpu.memory_space<vmem>>, vector<16x16xbf16>,
    %c0_7 = arith.constant 0 : index
    %c0_8 = arith.constant 0 : index
    %8 = vector.load %arg3[%c0_7, %c0_8] : memref<32x16xbf16, #tpu.memory_space<vmem>>, vector<32x16xbf16>
    %cst_9 = arith.constant dense<0.000000e+00> : vector<16x16xf32>
    %9 = tpu.matmul %0, %8, %cst_9 {dimension_numbers = #tpu.dot_dimension_numbers<[1], [0], [0], [1], [0, 0, 1, 1], [], []>} : vector<16x32xbf16>, vector<32x16xbf16>, vector<16x16xf32> -> vector<16x16xf32>
    %c0_10 = arith.constant 0 : index
    %c0_11 = arith.constant 0 : index
    %10 = vector.load %arg8[%c0_10, %c0_11] : memref<1x16xf32, #tpu.memory_space<vmem>>, vector<1x16xf32>
    %11 = vector.broadcast %10 : vector<1x16xf32> to vector<16x16xf32>
    %12 = arith.addf %9, %11 : vector<16x16xf32>
    %13 = arith.truncf %12 : vector<16x16xf32> to vector<16x16xbf16>
    %c0_12 = arith.constant 0 : index
    %c0_13 = arith.constant 0 : index
    %14 = vector.load %arg13[%c0_12, %c0_13] : memref<16x16xbf16, #tpu.memory_space<vmem>>, vector<16x16xbf16>
    tpu.vector_store %arg13[%c0_12, %c0_13], %13 {strides = array<i32>} : memref<16x16xbf16, #tpu.memory_space<vmem>>, vector<16x16xbf16>,
    %c0_14 = arith.constant 0 : index
    %c0_15 = arith.constant 0 : index
    %15 = vector.load %arg4[%c0_14, %c0_15] : memref<32x16xbf16, #tpu.memory_space<vmem>>, vector<32x16xbf16>
    %cst_16 = arith.constant dense<0.000000e+00> : vector<16x16xf32>
    %16 = tpu.matmul %0, %15, %cst_16 {dimension_numbers = #tpu.dot_dimension_numbers<[1], [0], [0], [1], [0, 0, 1, 1], [], []>} : vector<16x32xbf16>, vector<32x16xbf16>, vector<16x16xf32> -> vector<16x16xf32>
    %c0_17 = arith.constant 0 : index
    %c0_18 = arith.constant 0 : index
    %17 = vector.load %arg9[%c0_17, %c0_18] : memref<1x16xf32, #tpu.memory_space<vmem>>, vector<1x16xf32>
    %18 = vector.broadcast %17 : vector<1x16xf32> to vector<16x16xf32>
    %19 = arith.addf %16, %18 : vector<16x16xf32>
    %20 = arith.truncf %19 : vector<16x16xf32> to vector<16x16xbf16>
    %c0_19 = arith.constant 0 : index
    %c0_20 = arith.constant 0 : index
    %21 = vector.load %arg14[%c0_19, %c0_20] : memref<16x16xbf16, #tpu.memory_space<vmem>>, vector<16x16xbf16>
    tpu.vector_store %arg14[%c0_19, %c0_20], %20 {strides = array<i32>} : memref<16x16xbf16, #tpu.memory_space<vmem>>, vector<16x16xbf16>,
    %c0_21 = arith.constant 0 : index
    %c0_22 = arith.constant 0 : index
    %22 = vector.load %arg5[%c0_21, %c0_22] : memref<32x16xbf16, #tpu.memory_space<vmem>>, vector<32x16xbf16>
    %cst_23 = arith.constant dense<0.000000e+00> : vector<16x16xf32>
    %23 = tpu.matmul %0, %22, %cst_23 {dimension_numbers = #tpu.dot_dimension_numbers<[1], [0], [0], [1], [0, 0, 1, 1], [], []>} : vector<16x32xbf16>, vector<32x16xbf16>, vector<16x16xf32> -> vector<16x16xf32>
    %c0_24 = arith.constant 0 : index
    %c0_25 = arith.constant 0 : index
    %24 = vector.load %arg10[%c0_24, %c0_25] : memref<1x16xf32, #tpu.memory_space<vmem>>, vector<1x16xf32>
    %25 = vector.broadcast %24 : vector<1x16xf32> to vector<16x16xf32>
    %26 = arith.addf %23, %25 : vector<16x16xf32>
    %27 = arith.truncf %26 : vector<16x16xf32> to vector<16x16xbf16>
    %c0_26 = arith.constant 0 : index
    %c0_27 = arith.constant 0 : index
    %28 = vector.load %arg15[%c0_26, %c0_27] : memref<16x16xbf16, #tpu.memory_space<vmem>>, vector<16x16xbf16>
    tpu.vector_store %arg15[%c0_26, %c0_27], %27 {strides = array<i32>} : memref<16x16xbf16, #tpu.memory_space<vmem>>, vector<16x16xbf16>,
    %c0_28 = arith.constant 0 : index
    %c0_29 = arith.constant 0 : index
    %29 = vector.load %arg6[%c0_28, %c0_29] : memref<32x32xbf16, #tpu.memory_space<vmem>>, vector<32x32xbf16>
    %cst_30 = arith.constant dense<0.000000e+00> : vector<16x32xf32>
    %30 = tpu.matmul %0, %29, %cst_30 {dimension_numbers = #tpu.dot_dimension_numbers<[1], [0], [0], [1], [0, 0, 1, 1], [], []>} : vector<16x32xbf16>, vector<32x32xbf16>, vector<16x32xf32> -> vector<16x32xf32>
    %c0_31 = arith.constant 0 : index
    %c0_32 = arith.constant 0 : index
    %31 = vector.load %arg11[%c0_31, %c0_32] : memref<1x32xf32, #tpu.memory_space<vmem>>, vector<1x32xf32>
    %32 = vector.broadcast %31 : vector<1x32xf32> to vector<16x32xf32>
    %33 = arith.addf %30, %32 : vector<16x32xf32>
    %34 = arith.truncf %33 : vector<16x32xf32> to vector<16x32xbf16>
    %c0_33 = arith.constant 0 : index
    %c0_34 = arith.constant 0 : index
    %35 = vector.load %arg16[%c0_33, %c0_34] : memref<16x32xbf16, #tpu.memory_space<vmem>>, vector<16x32xbf16>
    tpu.vector_store %arg16[%c0_33, %c0_34], %34 {strides = array<i32>} : memref<16x32xbf16, #tpu.memory_space<vmem>>, vector<16x32xbf16>,
    return
  }
  func.func @transform_0(%arg0: i32) -> (i32, i32) {
    %c0_i32 = arith.constant 0 : i32
    %c0_i32_0 = arith.constant 0 : i32
    return %arg0, %c0_i32 : i32, i32
  }
  func.func @transform_1(%arg0: i32) -> (i32, i32) {
    %c0_i32 = arith.constant 0 : i32
    %c0_i32_0 = arith.constant 0 : i32
    %c0_i32_1 = arith.constant 0 : i32
    return %c0_i32, %c0_i32_0 : i32, i32
  }
  func.func @transform_2(%arg0: i32) -> (i32, i32) {
    %c0_i32 = arith.constant 0 : i32
    %c0_i32_0 = arith.constant 0 : i32
    %c0_i32_1 = arith.constant 0 : i32
    return %c0_i32, %c0_i32_0 : i32, i32
  }
  func.func @transform_3(%arg0: i32) -> (i32, i32) {
    %c0_i32 = arith.constant 0 : i32
    %c0_i32_0 = arith.constant 0 : i32
    %c0_i32_1 = arith.constant 0 : i32
    return %c0_i32, %c0_i32_0 : i32, i32
  }
  func.func @transform_4(%arg0: i32) -> (i32, i32) {
    %c0_i32 = arith.constant 0 : i32
    %c0_i32_0 = arith.constant 0 : i32
    %c0_i32_1 = arith.constant 0 : i32
    return %c0_i32, %c0_i32_0 : i32, i32
  }
  func.func @transform_5(%arg0: i32) -> (i32, i32) {
    %c0_i32 = arith.constant 0 : i32
    %c0_i32_0 = arith.constant 0 : i32
    %c0_i32_1 = arith.constant 0 : i32
    return %c0_i32, %c0_i32_0 : i32, i32
  }
  func.func @transform_6(%arg0: i32) -> (i32, i32) {
    %c0_i32 = arith.constant 0 : i32
    %c0_i32_0 = arith.constant 0 : i32
    %c0_i32_1 = arith.constant 0 : i32
    return %c0_i32, %c0_i32_0 : i32, i32
  }
  func.func @transform_7(%arg0: i32) -> (i32, i32) {
    %c0_i32 = arith.constant 0 : i32
    %c0_i32_0 = arith.constant 0 : i32
    %c0_i32_1 = arith.constant 0 : i32
    return %c0_i32, %c0_i32_0 : i32, i32
  }
  func.func @transform_8(%arg0: i32) -> (i32, i32) {
    %c0_i32 = arith.constant 0 : i32
    %c0_i32_0 = arith.constant 0 : i32
    %c0_i32_1 = arith.constant 0 : i32
    return %c0_i32, %c0_i32_0 : i32, i32
  }
  func.func @transform_9(%arg0: i32) -> (i32, i32) {
    %c0_i32 = arith.constant 0 : i32
    %c0_i32_0 = arith.constant 0 : i32
    %c0_i32_1 = arith.constant 0 : i32
    return %c0_i32, %c0_i32_0 : i32, i32
  }
  func.func @transform_10(%arg0: i32) -> (i32, i32) {
    %c0_i32 = arith.constant 0 : i32
    %c0_i32_0 = arith.constant 0 : i32
    %c0_i32_1 = arith.constant 0 : i32
    return %c0_i32, %c0_i32_0 : i32, i32
  }
  func.func @transform_11(%arg0: i32) -> (i32, i32) {
    %c0_i32 = arith.constant 0 : i32
    %c0_i32_0 = arith.constant 0 : i32
    return %arg0, %c0_i32 : i32, i32
  }
  func.func @transform_12(%arg0: i32) -> (i32, i32) {
    %c0_i32 = arith.constant 0 : i32
    %c0_i32_0 = arith.constant 0 : i32
    return %arg0, %c0_i32 : i32, i32
  }
  func.func @transform_13(%arg0: i32) -> (i32, i32) {
    %c0_i32 = arith.constant 0 : i32
    %c0_i32_0 = arith.constant 0 : i32
    return %arg0, %c0_i32 : i32, i32
  }
  func.func @transform_14(%arg0: i32) -> (i32, i32) {
    %c0_i32 = arith.constant 0 : i32
    %c0_i32_0 = arith.constant 0 : i32
    return %arg0, %c0_i32 : i32, i32
  }
  func.func @transform_15(%arg0: i32) -> (i32, i32) {
    %c0_i32 = arith.constant 0 : i32
    %c0_i32_0 = arith.constant 0 : i32
    return %arg0, %c0_i32 : i32, i32
  }
}

</mosaic_0001>

<bundles_post_ra>
// kernel: tpu_custom_call.1
= control target key start
LH: loop header
LB: loop body
LE: loop exit
PB: predicated region body
PF: predicated region fallthrough
CT: control target
= control target key end

     0   :  { %s1353_s18 = smov 0   ;;  %s1453_s0 = inlined_call_operand.vmem [shape: bf16[64,32], index: 0, kind: input, shape index: {}]   ;;  %s1454_s1 = inlined_call_operand.vmem [shape: bf16[32,16], index: 1, kind: input, shape index: {}]   ;;  %s1455_s2 = inlined_call_operand.vmem [shape: bf16[32,16], index: 2, kind: input, shape index: {}]   ;;  %s1456_s3 = inlined_call_operand.vmem [shape: bf16[32,16], index: 3, kind: input, shape index: {}]   ;;  %s1457_s4 = inlined_call_operand.vmem [shape: bf16[32,16], index: 4, kind: input, shape index: {}]   ;;  %s1458_s5 = inlined_call_operand.vmem [shape: bf16[32,32], index: 5, kind: input, shape index: {}]   ;;  %s1459_s6 = inlined_call_operand.vmem [shape: f32[1,16], index: 6, kind: input, shape index: {}]   ;;  %s1460_s7 = inlined_call_operand.vmem [shape: f32[1,16], index: 7, kind: input, shape index: {}]   ;;  %s1461_s8 = inlined_call_operand.vmem [shape: f32[1,16], index: 8, kind: input, shape index: {}]   ;;  %s1462_s9 = inlined_call_operand.vmem [shape: f32[1,16], index: 9, kind: input, shape index: {}]   ;;  %s1463_s10 = inlined_call_operand.vmem [shape: f32[1,32], index: 10, kind: input, shape index: {}]   ;;  %s1464_s11 = inlined_call_operand.vmem [shape: bf16[64,16], index: 11, kind: output, shape index: {0}]   ;;  %s1465_s12 = inlined_call_operand.vmem [shape: bf16[64,16], index: 12, kind: output, shape index: {1}]   ;;  %s1466_s13 = inlined_call_operand.vmem [shape: bf16[64,16], index: 13, kind: output, shape index: {2}]   ;;  %s1467_s14 = inlined_call_operand.vmem [shape: bf16[64,16], index: 14, kind: output, shape index: {3}]   ;;  %s1468_s15 = inlined_call_operand.vmem [shape: bf16[64,32], index: 15, kind: output, shape index: {4}]  }
   0x1 LB: > { %s1127_s19 = sadd.s32 4294967295, %s1269_s18   ;;  %p1131_p0 = scmp.ge.s32.totalorder %s1269_s18, 1  ;;  %s1269_s18 = sphi %s1353_s18, %s26_s18  }
   0x2   : > { %p447_p1 = scmp.lt.s32.totalorder %s1269_s18, 5 }
   0x4   : > { %p448_p2 = pnand %p1131_p0, %p447_p1 }
   0x5   : > { %v1252_v0 = vld [vmem:[%s1454_s1] sm:$0xff] (!%p448_p2)   ;;  %v1271_v1 = vmov (!%p448_p2), 0.0   ;;  %v1253_v2 = vld [vmem:[%s1454_s1 + $0x8] sm:$0xff] (!%p448_p2)   ;;  %vm1272_vm0 = vmmov (!%p448_p2), 0   ;;  %s1132_s26 = sshll.u32 (!%p448_p2), %s1127_s19, 1  ;;  %vm582_vm1 = vcmask (!%p448_p2), 261120  }
   0x6   : > { %451 = sbr.rel (%p448_p2) target bundleno = 252 (0xfc), region = 64  ;;  %1202 = vmatprep.subr.bf16.mxu0 (!%p448_p2), %v1271_v1  ;;  %1210 = vmatprep.subr.bf16.mxu1 (!%p448_p2), %v1271_v1  ;;  %v1254_v3 = vld [vmem:[%s1455_s2] sm:$0xff] (!%p448_p2)   ;;  %p516_p3 = scmp.lt.s32.totalorder (!%p448_p2), %s1132_s26, 7  ;;  %v1257_v4 = vld [vmem:[%s1455_s2 + $0x8] sm:$0xff] (!%p448_p2)   ;;  %vm635_vm2 = vcmask (!%p448_p2), 125952   ;;  %vm932_vm3 = vcmask (!%p448_p2), 257024  }
   0x7   : > { %1203 = vmatpush3.bf16.msra.mxu0 (!%p448_p2), %v1252_v0  ;;  %1206 = vmatprep.mubr.msk.bf16.mxu0 (!%p448_p2), %vm1272_vm0, %v1271_v1  ;;  %v1256_v5 = vld [vmem:[%s1456_s3] sm:$0xff] (!%p448_p2)   ;;  %v1258_v8 = vld [vmem:[%s1456_s3 + $0x8] sm:$0xff] (!%p448_p2)  }
   0x8   : > { %1204 = vmatprep.subr.bf16.mxu0 (!%p448_p2), %v1271_v1  ;;  %1214 = vmatprep.mubr.msk.bf16.mxu1 (!%p448_p2), %vm1272_vm0, %v1271_v1  ;;  %v1259_v6 = vld [vmem:[%s1457_s4] sm:$0xff] (!%p448_p2)   ;;  %v1261_v9 = vld [vmem:[%s1457_s4 + $0x8] sm:$0xff] (!%p448_p2)  }
   0x9   : > { %1211 = vmatpush3.bf16.msra.mxu1 (!%p448_p2), %v1254_v3  ;;  %v1260_v10 = vld [vmem:[%s1458_s5] sm:$0xff] (!%p448_p2)   ;;  %v1262_v11 = vld [vmem:[%s1458_s5 + $0x8] sm:$0xff] (!%p448_p2)  }
   0xa   : > { %1212 = vmatprep.subr.bf16.mxu1 (!%p448_p2), %v1271_v1  ;;  %v1144_v12 = vld [vmem:[%s1459_s6] ss:$0 sm:$0xff] (!%p448_p2) }
   0xb   : > { %1205 = vmatpush3.bf16.msra.mxu0 (!%p448_p2), %v1253_v2  ;;  %v1151_v13 = vld [vmem:[%s1460_s7] ss:$0 sm:$0xff] (!%p448_p2) }
   0xc   : > { %1218 = vmatprep.subr.bf16.mxu0 (!%p448_p2), %v1271_v1  ;;  %v1157_v30 = vld [vmem:[%s1461_s8] ss:$0 sm:$0xff] (!%p448_p2) }
   0xd   : > { %s1470_s26 = smov (!%p516_p3, %s1132_s26), 7  ;;  %1213 = vmatpush3.bf16.msra.mxu1 %v1257_v4  ;;  %v1163_v31 = vld [vmem:[%s1462_s9] ss:$0 sm:$0xff] }
   0xe   : > { %s1375_s29 = sshll.u32 %s1470_s26, 2  ;;  %1226 = vmatprep.subr.bf16.mxu1 %v1271_v1  ;;  %v1169_v48 = vld [vmem:[%s1463_s10] ss:$0 sm:$0xff] }
   0xf   : > { %s519_s20 = scalar_lea.vmem %s1453_s0, %s1375_s29  ;;  %s525_s24 = scalar_lea.vmem %s1464_s11, %s1375_s29 }
  0x10   : > { %v1255_v7 = vld [vmem:[%s519_s20] sm:$0xff]   ;;  %s531_s27 = scalar_lea.vmem %s1465_s12, %s1375_s29  ;;  %s537_s21 = scalar_lea.vmem %s1466_s13, %s1375_s29 }
  0x11   : > { %1207 = vmatmul.mubr.msk.bf16.vlgmr.msra.gmra.mrb[0].mxu0 %vm582_vm1, %v1255_v7  ;;  %1215 = vmatmul.mubr.msk.bf16.vlgmr.msra.gmra.mrb[0].mxu1 %vm582_vm1, %v1255_v7  ;;  %s549_s30 = scalar_lea.vmem %s1468_s15, %s1375_s29 }
  0x12   : > { %1219 = vmatpush3.bf16.msra.mxu0 %v1256_v5  ;;  %1222 = vmatprep.mubr.msk.bf16.mxu0 %vm1272_vm0, %v1271_v1 }
  0x13   : > { %1220 = vmatprep.subr.bf16.mxu0 %v1271_v1  ;;  %1227 = vmatpush3.bf16.msra.mxu1 %v1259_v6 }
  0x14   : > { %1228 = vmatprep.subr.bf16.mxu1 %v1271_v1  ;;  %1230 = vmatprep.mubr.msk.bf16.mxu1 %vm1272_vm0, %v1271_v1 }
  0x16   : > { %1221 = vmatpush3.bf16.msra.mxu0 %v1258_v8 }
  0x17   : > { %1234 = vmatprep.subr.bf16.mxu0 %v1271_v1  ;;  %1229 = vmatpush3.bf16.msra.mxu1 %v1261_v9 }
  0x19   : > { %1223 = vmatmul.mubr.msk.bf16.vlgmr.msra.gmra.mrb[4].mxu0 %vm582_vm1, %v1255_v7 }
  0x1a   : > { %1235 = vmatpush3.bf16.msra.mxu0 %v1260_v10  ;;  %1231 = vmatmul.mubr.msk.bf16.vlgmr.msra.gmra.mrb[4].mxu1 %vm582_vm1, %v1255_v7 }
  0x1b   : > { %1236 = vmatprep.subr.bf16.mxu0 %v1271_v1  ;;  %1238 = vmatprep.mubr.msk.bf16.mxu0 %vm1272_vm0, %v1271_v1 }
  0x1e   : > { %1237 = vmatpush3.bf16.msra.mxu0 %v1262_v11 }
  0x21   : > { %1239 = vmatmul.mubr.msk.bf16.vlgmr.msra.gmra.mrb[8].mxu0 %vm582_vm1, %v1255_v7 }
  0xe4   : > { %v620_v14 = vpop.f32.mrb[0].mxu0  ;;  %v695_v15 = vpop.f32.mrb[0].mxu1 }
  0xe5   : > { %v621_v16 = vadd.f32 %v1144_v12, %v620_v14  ;;  %v1208_v17 = vpop.f32.mrb[1].mxu0  ;;  %v696_v18 = vadd.f32 %v1151_v13, %v695_v15  ;;  %v1216_v19 = vpop.f32.mrb[1].mxu1 }
  0xe6   : > { %v623_v20 = vpop.f32.mrb[2].mxu0  ;;  %v698_v21 = vpop.f32.mrb[2].mxu1 }
  0xe7   : > { %v1177_v22 = vpack.c.bf16 %v621_v16, %v621_v16  ;;  %v624_v23 = vadd.f32 %v1144_v12, %v623_v20  ;;  %v1209_v24 = vpop.f32.mrb[3].mxu0  ;;  %v1179_v25 = vpack.c.bf16 %v696_v18, %v696_v18  ;;  %v699_v26 = vadd.f32 %v1151_v13, %v698_v21  ;;  %v1217_v27 = vpop.f32.mrb[3].mxu1 }
  0xe9   : > { %636 = vst.msk [vmem:[%s525_s24] sm:$0xf] %vm635_vm2, %v1177_v22  ;;  %v1178_v28 = vpack.c.bf16 %v624_v23, %v624_v23  ;;  %710 = vst.msk [vmem:[%s531_s27] sm:$0xf] %vm635_vm2, %v1179_v25  ;;  %v1180_v29 = vpack.c.bf16 %v699_v26, %v699_v26 }
  0xeb   : > { %637 = vst.msk [vmem:[%s525_s24 + $0x4] sm:$0xf] %vm635_vm2, %v1178_v28  ;;  %711 = vst.msk [vmem:[%s531_s27 + $0x4] sm:$0xf] %vm635_vm2, %v1180_v29  ;;  %s543_s24 = scalar_lea.vmem %s1467_s14, %s1375_s29 }
  0xec   : > { %v769_v32 = vpop.f32.mrb[4].mxu0 }
  0xed   : > { %v770_v33 = vadd.f32 %v1157_v30, %v769_v32  ;;  %v1224_v34 = vpop.f32.mrb[5].mxu0  ;;  %v843_v35 = vpop.f32.mrb[4].mxu1 }
  0xee   : > { %v772_v36 = vpop.f32.mrb[6].mxu0  ;;  %v844_v37 = vadd.f32 %v1163_v31, %v843_v35  ;;  %v1232_v38 = vpop.f32.mrb[5].mxu1 }
  0xef   : > { %v1181_v39 = vpack.c.bf16 %v770_v33, %v770_v33  ;;  %v773_v40 = vadd.f32 %v1157_v30, %v772_v36  ;;  %v1225_v41 = vpop.f32.mrb[7].mxu0  ;;  %v846_v42 = vpop.f32.mrb[6].mxu1 }
  0xf0   : > { %v1183_v43 = vpack.c.bf16 %v844_v37, %v844_v37  ;;  %v847_v44 = vadd.f32 %v1163_v31, %v846_v42  ;;  %v1233_v45 = vpop.f32.mrb[7].mxu1 }
  0xf1   : > { %784 = vst.msk [vmem:[%s537_s21] sm:$0xf] %vm635_vm2, %v1181_v39  ;;  %v1182_v46 = vpack.c.bf16 %v773_v40, %v773_v40 }
  0xf2   : > { %858 = vst.msk [vmem:[%s543_s24] sm:$0xf] %vm635_vm2, %v1183_v43  ;;  %v1184_v47 = vpack.c.bf16 %v847_v44, %v847_v44 }
  0xf3   : > { %785 = vst.msk [vmem:[%s537_s21 + $0x4] sm:$0xf] %vm635_vm2, %v1182_v46 }
  0xf4   : > { %859 = vst.msk [vmem:[%s543_s24 + $0x4] sm:$0xf] %vm635_vm2, %v1184_v47  ;;  %v917_v49 = vpop.f32.mrb[8].mxu0 }
  0xf5   : > { %v918_v50 = vadd.f32 %v1169_v48, %v917_v49  ;;  %v1240_v51 = vpop.f32.mrb[9].mxu0 }
  0xf6   : > { %v920_v52 = vpop.f32.mrb[10].mxu0 }
  0xf7   : > { %v1185_v53 = vpack.c.bf16 %v918_v50, %v918_v50  ;;  %v921_v54 = vadd.f32 %v1169_v48, %v920_v52  ;;  %v1241_v55 = vpop.f32.mrb[11].mxu0 }
  0xf9   : > { %933 = vst.msk [vmem:[%s549_s30] sm:$0xf] %vm932_vm3, %v1185_v53  ;;  %v1186_v56 = vpack.c.bf16 %v921_v54, %v921_v54 }
  0xfb   : > { %934 = vst.msk [vmem:[%s549_s30 + $0x4] sm:$0xf] %vm932_vm3, %v1186_v56 }
  0xfc PF: > { %s26_s18 = sadd.s32 1, %s1269_s18  }
  0xfd   : > { %p23_p4 = scmp.ge.s32.totalorder %s26_s18, 6  }
  0xff   :  { %25 = sbr.rel (!%p23_p4) target bundleno = 1 (0x1), region = 142 }

// kernel: tpu_custom_call.1
= control target key start
LH: loop header
LB: loop body
LE: loop exit
PB: predicated region body
PF: predicated region fallthrough
CT: control target
= control target key end

     0   :  { %s1353_s18 = smov 0   ;;  %s1453_s0 = inlined_call_operand.vmem [shape: bf16[64,32], index: 0, kind: input, shape index: {}]   ;;  %s1454_s1 = inlined_call_operand.vmem [shape: bf16[32,16], index: 1, kind: input, shape index: {}]   ;;  %s1455_s2 = inlined_call_operand.vmem [shape: bf16[32,16], index: 2, kind: input, shape index: {}]   ;;  %s1456_s3 = inlined_call_operand.vmem [shape: bf16[32,16], index: 3, kind: input, shape index: {}]   ;;  %s1457_s4 = inlined_call_operand.vmem [shape: bf16[32,16], index: 4, kind: input, shape index: {}]   ;;  %s1458_s5 = inlined_call_operand.vmem [shape: bf16[32,32], index: 5, kind: input, shape index: {}]   ;;  %s1459_s6 = inlined_call_operand.vmem [shape: f32[1,16], index: 6, kind: input, shape index: {}]   ;;  %s1460_s7 = inlined_call_operand.vmem [shape: f32[1,16], index: 7, kind: input, shape index: {}]   ;;  %s1461_s8 = inlined_call_operand.vmem [shape: f32[1,16], index: 8, kind: input, shape index: {}]   ;;  %s1462_s9 = inlined_call_operand.vmem [shape: f32[1,16], index: 9, kind: input, shape index: {}]   ;;  %s1463_s10 = inlined_call_operand.vmem [shape: f32[1,32], index: 10, kind: input, shape index: {}]   ;;  %s1464_s11 = inlined_call_operand.vmem [shape: bf16[64,16], index: 11, kind: output, shape index: {0}]   ;;  %s1465_s12 = inlined_call_operand.vmem [shape: bf16[64,16], index: 12, kind: output, shape index: {1}]   ;;  %s1466_s13 = inlined_call_operand.vmem [shape: bf16[64,16], index: 13, kind: output, shape index: {2}]   ;;  %s1467_s14 = inlined_call_operand.vmem [shape: bf16[64,16], index: 14, kind: output, shape index: {3}]   ;;  %s1468_s15 = inlined_call_operand.vmem [shape: bf16[64,32], index: 15, kind: output, shape index: {4}]  }
   0x1 LB: > { %s1127_s19 = sadd.s32 4294967295, %s1269_s18   ;;  %p1131_p0 = scmp.ge.s32.totalorder %s1269_s18, 1  ;;  %s1269_s18 = sphi %s1353_s18, %s26_s18  }
   0x2   : > { %p447_p1 = scmp.lt.s32.totalorder %s1269_s18, 5 }
   0x4   : > { %p448_p2 = pnand %p1131_p0, %p447_p1 }
   0x5   : > { %v1252_v0 = vld [vmem:[%s1454_s1] sm:$0xff] (!%p448_p2)   ;;  %v1271_v1 = vmov (!%p448_p2), 0.0   ;;  %v1253_v2 = vld [vmem:[%s1454_s1 + $0x8] sm:$0xff] (!%p448_p2)   ;;  %vm1272_vm0 = vmmov (!%p448_p2), 0   ;;  %s1132_s26 = sshll.u32 (!%p448_p2), %s1127_s19, 1  ;;  %vm582_vm1 = vcmask (!%p448_p2), 261120  }
   0x6   : > { %451 = sbr.rel (%p448_p2) target bundleno = 252 (0xfc), region = 64  ;;  %1202 = vmatprep.subr.bf16.mxu0 (!%p448_p2), %v1271_v1  ;;  %1210 = vmatprep.subr.bf16.mxu1 (!%p448_p2), %v1271_v1  ;;  %v1254_v3 = vld [vmem:[%s1455_s2] sm:$0xff] (!%p448_p2)   ;;  %p516_p3 = scmp.lt.s32.totalorder (!%p448_p2), %s1132_s26, 7  ;;  %v1257_v4 = vld [vmem:[%s1455_s2 + $0x8] sm:$0xff] (!%p448_p2)   ;;  %vm635_vm2 = vcmask (!%p448_p2), 125952   ;;  %vm932_vm3 = vcmask (!%p448_p2), 257024  }
   0x7   : > { %1203 = vmatpush3.bf16.msra.mxu0 (!%p448_p2), %v1252_v0  ;;  %1206 = vmatprep.mubr.msk.bf16.mxu0 (!%p448_p2), %vm1272_vm0, %v1271_v1  ;;  %v1256_v5 = vld [vmem:[%s1456_s3] sm:$0xff] (!%p448_p2)   ;;  %v1258_v8 = vld [vmem:[%s1456_s3 + $0x8] sm:$0xff] (!%p448_p2)  }
   0x8   : > { %1204 = vmatprep.subr.bf16.mxu0 (!%p448_p2), %v1271_v1  ;;  %1214 = vmatprep.mubr.msk.bf16.mxu1 (!%p448_p2), %vm1272_vm0, %v1271_v1  ;;  %v1259_v6 = vld [vmem:[%s1457_s4] sm:$0xff] (!%p448_p2)   ;;  %v1261_v9 = vld [vmem:[%s1457_s4 + $0x8] sm:$0xff] (!%p448_p2)  }
   0x9   : > { %1211 = vmatpush3.bf16.msra.mxu1 (!%p448_p2), %v1254_v3  ;;  %v1260_v10 = vld [vmem:[%s1458_s5] sm:$0xff] (!%p448_p2)   ;;  %v1262_v11 = vld [vmem:[%s1458_s5 + $0x8] sm:$0xff] (!%p448_p2)  }
   0xa   : > { %1212 = vmatprep.subr.bf16.mxu1 (!%p448_p2), %v1271_v1  ;;  %v1144_v12 = vld [vmem:[%s1459_s6] ss:$0 sm:$0xff] (!%p448_p2) }
   0xb   : > { %1205 = vmatpush3.bf16.msra.mxu0 (!%p448_p2), %v1253_v2  ;;  %v1151_v13 = vld [vmem:[%s1460_s7] ss:$0 sm:$0xff] (!%p448_p2) }
   0xc   : > { %1218 = vmatprep.subr.bf16.mxu0 (!%p448_p2), %v1271_v1  ;;  %v1157_v30 = vld [vmem:[%s1461_s8] ss:$0 sm:$0xff] (!%p448_p2) }
   0xd   : > { %s1470_s26 = smov (!%p516_p3, %s1132_s26), 7  ;;  %1213 = vmatpush3.bf16.msra.mxu1 %v1257_v4  ;;  %v1163_v31 = vld [vmem:[%s1462_s9] ss:$0 sm:$0xff] }
   0xe   : > { %s1375_s29 = sshll.u32 %s1470_s26, 2  ;;  %1226 = vmatprep.subr.bf16.mxu1 %v1271_v1  ;;  %v1169_v48 = vld [vmem:[%s1463_s10] ss:$0 sm:$0xff] }
   0xf   : > { %s519_s20 = scalar_lea.vmem %s1453_s0, %s1375_s29  ;;  %s525_s24 = scalar_lea.vmem %s1464_s11, %s1375_s29 }
  0x10   : > { %v1255_v7 = vld [vmem:[%s519_s20] sm:$0xff]   ;;  %s531_s27 = scalar_lea.vmem %s1465_s12, %s1375_s29  ;;  %s537_s21 = scalar_lea.vmem %s1466_s13, %s1375_s29 }
  0x11   : > { %1207 = vmatmul.mubr.msk.bf16.vlgmr.msra.gmra.mrb[0].mxu0 %vm582_vm1, %v1255_v7  ;;  %1215 = vmatmul.mubr.msk.bf16.vlgmr.msra.gmra.mrb[0].mxu1 %vm582_vm1, %v1255_v7  ;;  %s549_s30 = scalar_lea.vmem %s1468_s15, %s1375_s29 }
  0x12   : > { %1219 = vmatpush3.bf16.msra.mxu0 %v1256_v5  ;;  %1222 = vmatprep.mubr.msk.bf16.mxu0 %vm1272_vm0, %v1271_v1 }
  0x13   : > { %1220 = vmatprep.subr.bf16.mxu0 %v1271_v1  ;;  %1227 = vmatpush3.bf16.msra.mxu1 %v1259_v6 }
  0x14   : > { %1228 = vmatprep.subr.bf16.mxu1 %v1271_v1  ;;  %1230 = vmatprep.mubr.msk.bf16.mxu1 %vm1272_vm0, %v1271_v1 }
  0x16   : > { %1221 = vmatpush3.bf16.msra.mxu0 %v1258_v8 }
  0x17   : > { %1234 = vmatprep.subr.bf16.mxu0 %v1271_v1  ;;  %1229 = vmatpush3.bf16.msra.mxu1 %v1261_v9 }
  0x19   : > { %1223 = vmatmul.mubr.msk.bf16.vlgmr.msra.gmra.mrb[4].mxu0 %vm582_vm1, %v1255_v7 }
  0x1a   : > { %1235 = vmatpush3.bf16.msra.mxu0 %v1260_v10  ;;  %1231 = vmatmul.mubr.msk.bf16.vlgmr.msra.gmra.mrb[4].mxu1 %vm582_vm1, %v1255_v7 }
  0x1b   : > { %1236 = vmatprep.subr.bf16.mxu0 %v1271_v1  ;;  %1238 = vmatprep.mubr.msk.bf16.mxu0 %vm1272_vm0, %v1271_v1 }
  0x1e   : > { %1237 = vmatpush3.bf16.msra.mxu0 %v1262_v11 }
  0x21   : > { %1239 = vmatmul.mubr.msk.bf16.vlgmr.msra.gmra.mrb[8].mxu0 %vm582_vm1, %v1255_v7 }
  0xe4   : > { %v620_v14 = vpop.f32.mrb[0].mxu0  ;;  %v695_v15 = vpop.f32.mrb[0].mxu1 }
  0xe5   : > { %v621_v16 = vadd.f32 %v1144_v12, %v620_v14  ;;  %v1208_v17 = vpop.f32.mrb[1].mxu0  ;;  %v696_v18 = vadd.f32 %v1151_v13, %v695_v15  ;;  %v1216_v19 = vpop.f32.mrb[1].mxu1 }
  0xe6   : > { %v623_v20 = vpop.f32.mrb[2].mxu0  ;;  %v698_v21 = vpop.f32.mrb[2].mxu1 }
  0xe7   : > { %v1177_v22 = vpack.c.bf16 %v621_v16, %v621_v16  ;;  %v624_v23 = vadd.f32 %v1144_v12, %v623_v20  ;;  %v1209_v24 = vpop.f32.mrb[3].mxu0  ;;  %v1179_v25 = vpack.c.bf16 %v696_v18, %v696_v18  ;;  %v699_v26 = vadd.f32 %v1151_v13, %v698_v21  ;;  %v1217_v27 = vpop.f32.mrb[3].mxu1 }
  0xe9   : > { %636 = vst.msk [vmem:[%s525_s24] sm:$0xf] %vm635_vm2, %v1177_v22  ;;  %v1178_v28 = vpack.c.bf16 %v624_v23, %v624_v23  ;;  %710 = vst.msk [vmem:[%s531_s27] sm:$0xf] %vm635_vm2, %v1179_v25  ;;  %v1180_v29 = vpack.c.bf16 %v699_v26, %v699_v26 }
  0xeb   : > { %637 = vst.msk [vmem:[%s525_s24 + $0x4] sm:$0xf] %vm635_vm2, %v1178_v28  ;;  %711 = vst.msk [vmem:[%s531_s27 + $0x4] sm:$0xf] %vm635_vm2, %v1180_v29  ;;  %s543_s24 = scalar_lea.vmem %s1467_s14, %s1375_s29 }
  0xec   : > { %v769_v32 = vpop.f32.mrb[4].mxu0 }
  0xed   : > { %v770_v33 = vadd.f32 %v1157_v30, %v769_v32  ;;  %v1224_v34 = vpop.f32.mrb[5].mxu0  ;;  %v843_v35 = vpop.f32.mrb[4].mxu1 }
  0xee   : > { %v772_v36 = vpop.f32.mrb[6].mxu0  ;;  %v844_v37 = vadd.f32 %v1163_v31, %v843_v35  ;;  %v1232_v38 = vpop.f32.mrb[5].mxu1 }
  0xef   : > { %v1181_v39 = vpack.c.bf16 %v770_v33, %v770_v33  ;;  %v773_v40 = vadd.f32 %v1157_v30, %v772_v36  ;;  %v1225_v41 = vpop.f32.mrb[7].mxu0  ;;  %v846_v42 = vpop.f32.mrb[6].mxu1 }
  0xf0   : > { %v1183_v43 = vpack.c.bf16 %v844_v37, %v844_v37  ;;  %v847_v44 = vadd.f32 %v1163_v31, %v846_v42  ;;  %v1233_v45 = vpop.f32.mrb[7].mxu1 }
  0xf1   : > { %784 = vst.msk [vmem:[%s537_s21] sm:$0xf] %vm635_vm2, %v1181_v39  ;;  %v1182_v46 = vpack.c.bf16 %v773_v40, %v773_v40 }
  0xf2   : > { %858 = vst.msk [vmem:[%s543_s24] sm:$0xf] %vm635_vm2, %v1183_v43  ;;  %v1184_v47 = vpack.c.bf16 %v847_v44, %v847_v44 }
  0xf3   : > { %785 = vst.msk [vmem:[%s537_s21 + $0x4] sm:$0xf] %vm635_vm2, %v1182_v46 }
  0xf4   : > { %859 = vst.msk [vmem:[%s543_s24 + $0x4] sm:$0xf] %vm635_vm2, %v1184_v47  ;;  %v917_v49 = vpop.f32.mrb[8].mxu0 }
  0xf5   : > { %v918_v50 = vadd.f32 %v1169_v48, %v917_v49  ;;  %v1240_v51 = vpop.f32.mrb[9].mxu0 }
  0xf6   : > { %v920_v52 = vpop.f32.mrb[10].mxu0 }
  0xf7   : > { %v1185_v53 = vpack.c.bf16 %v918_v50, %v918_v50  ;;  %v921_v54 = vadd.f32 %v1169_v48, %v920_v52  ;;  %v1241_v55 = vpop.f32.mrb[11].mxu0 }
  0xf9   : > { %933 = vst.msk [vmem:[%s549_s30] sm:$0xf] %vm932_vm3, %v1185_v53  ;;  %v1186_v56 = vpack.c.bf16 %v921_v54, %v921_v54 }
  0xfb   : > { %934 = vst.msk [vmem:[%s549_s30 + $0x4] sm:$0xf] %vm932_vm3, %v1186_v56 }
  0xfc PF: > { %s26_s18 = sadd.s32 1, %s1269_s18  }
  0xfd   : > { %p23_p4 = scmp.ge.s32.totalorder %s26_s18, 6  }
  0xff   :  { %25 = sbr.rel (!%p23_p4) target bundleno = 1 (0x1), region = 142 }

</bundles_post_ra>
